<compile_context>
chip_gen: v6e
topology: v6e:2x2x1
jax: 0.10.0
libtpu: 0.0.40
codegen_flags: <defaults>
</compile_context>

<pallas_src>
import jax
import jax.numpy as jnp
from jax import lax
from jax.experimental import pallas as pl
from jax.experimental.pallas import tpu as pltpu

_MIB = 1024 * 1024
_EPS = 1e-5  # nn.LayerNorm default


def _round_up(a, b):
    return (a + b - 1) // b * b


def _vmem_cap_bytes():
    try:
        return int(pltpu.get_tpu_info().vmem_capacity_bytes)
    except Exception:  # pragma: no cover - defensive fallback
        return 64 * _MIB  # conservative: v7x per-TC VMEM


# --------------------------------------------------------------------------
# Kernel 1: weights fully VMEM-resident (fast path).
# --------------------------------------------------------------------------
def _ffn_kernel_resident(x_ref, w1_ref, b1_ref, w2_ref, b2_ref, g_ref,
                         beta_ref, o_ref):
    x_f32 = x_ref[...].astype(jnp.float32)        # residual / LayerNorm path
    x_bf = x_ref[...].astype(jnp.bfloat16)        # MXU operand

    # fc1 -> relu   (bf16 x bf16 -> f32 accumulate)
    h = jnp.dot(x_bf, w1_ref[...], preferred_element_type=jnp.float32)
    h = jnp.maximum(h + b1_ref[...], 0.0)

    # fc2 + bias + dropout(p=0) identity + residual
    out = jnp.dot(h.astype(jnp.bfloat16), w2_ref[...],
                  preferred_element_type=jnp.float32)
    out = out + b2_ref[...] + x_f32

    # LayerNorm over the model dim
    mean = jnp.mean(out, axis=-1, keepdims=True)
    centered = out - mean
    var = jnp.mean(centered * centered, axis=-1, keepdims=True)
    normed = centered * lax.rsqrt(var + _EPS)
    o_ref[...] = (normed * g_ref[...] + beta_ref[...]).astype(o_ref.dtype)


# --------------------------------------------------------------------------
# Kernel 2: hidden dim (H) tiled on an inner grid axis; fc2 partials go into
# an f32 accumulator scratch (for D*H too large to keep resident in VMEM).
# --------------------------------------------------------------------------
def _ffn_kernel_htiled(x_ref, w1_ref, b1_ref, w2_ref, b2_ref, g_ref, beta_ref,
                       o_ref, acc_ref):
    k = pl.program_id(1)

    @pl.when(k == 0)
    def _():
        acc_ref[...] = jnp.zeros_like(acc_ref)

    x_bf = x_ref[...].astype(jnp.bfloat16)
    h = jnp.dot(x_bf, w1_ref[...], preferred_element_type=jnp.float32)
    h = jnp.maximum(h + b1_ref[...], 0.0)
    acc_ref[...] += jnp.dot(h.astype(jnp.bfloat16), w2_ref[...],
                            preferred_element_type=jnp.float32)

    @pl.when(k == pl.num_programs(1) - 1)
    def _():
        out = acc_ref[...] + b2_ref[...] + x_ref[...].astype(jnp.float32)
        mean = jnp.mean(out, axis=-1, keepdims=True)
        centered = out - mean
        var = jnp.mean(centered * centered, axis=-1, keepdims=True)
        normed = centered * lax.rsqrt(var + _EPS)
        o_ref[...] = (normed * g_ref[...] + beta_ref[...]).astype(o_ref.dtype)


# --------------------------------------------------------------------------
# Parameter prep (do ONCE at init, not per forward call): weights -> bf16 MXU
# operands, vectors -> (1, N) f32 rows.
# --------------------------------------------------------------------------
def prepare_ffn_params(w1, b1, w2, b2, gamma, beta):
    D, H = w1.shape
    return dict(
        w1=w1.astype(jnp.bfloat16),
        b1=b1.reshape(1, H).astype(jnp.float32),
        w2=w2.astype(jnp.bfloat16),
        b2=b2.reshape(1, D).astype(jnp.float32),
        gamma=gamma.reshape(1, D).astype(jnp.float32),
        beta=beta.reshape(1, D).astype(jnp.float32),
    )


def position_wise_feed_forward(x, params, *, tm=512, hidden_tile=None,
                               force_h_tiled=False):
    """x: (B, S, D) f32 or bf16.  params: from prepare_ffn_params."""
    B, S, D = x.shape
    H = params["w1"].shape[1]
    M = B * S
    x_bytes = jnp.dtype(x.dtype).itemsize

    x2 = x.reshape(M, D)  # lane-dense (rows, dim_model) slab

    cap = _vmem_cap_bytes()
    budget = max(cap - 8 * _MIB, 16 * _MIB)  # leave Mosaic scratch headroom

    tm_req = max(8, _round_up(min(tm, _round_up(M, 8)), 8))

    # -- resident-weight VMEM estimate (Buffered(1) weights, 2x x/out tiles) --
    def est_resident(t):
        act = 4 * t * D * x_bytes                 # x + out tiles, double-buffered
        weights = 2 * (D * H + H * D)             # bf16, single-buffered
        smalls = 4 * (H + 3 * D)                  # biases + LN params
        temps = 2 * t * H * 4 + 4 * t * D * 4     # h + LN temporaries headroom
        return act + weights + smalls + temps

    tm_eff = tm_req
    while tm_eff > 8 and est_resident(tm_eff) > budget:
        tm_eff = max(8, _round_up(tm_eff // 2, 8))

    use_h_tiled = force_h_tiled or est_resident(tm_eff) > budget

    if not use_h_tiled:
        grid = (pl.cdiv(M, tm_eff),)  # ragged last tile handled by Pallas
        vmem_limit = int(min(budget, max(est_resident(tm_eff) + 4 * _MIB,
                                         32 * _MIB)))
        out2 = pl.pallas_call(
            _ffn_kernel_resident,
            out_shape=jax.ShapeDtypeStruct((M, D), x.dtype),
            grid_spec=pltpu.PrefetchScalarGridSpec(
                num_scalar_prefetch=0,
                grid=grid,
                in_specs=[
                    pl.BlockSpec((tm_eff, D), lambda i: (i, 0)),      # x rows
                    pl.BlockSpec((D, H), lambda i: (0, 0),
                                 pipeline_mode=pl.Buffered(1)),       # W1
                    pl.BlockSpec((1, H), lambda i: (0, 0),
                                 pipeline_mode=pl.Buffered(1)),       # b1
                    pl.BlockSpec((H, D), lambda i: (0, 0),
                                 pipeline_mode=pl.Buffered(1)),       # W2
                    pl.BlockSpec((1, D), lambda i: (0, 0),
                                 pipeline_mode=pl.Buffered(1)),       # b2
                    pl.BlockSpec((1, D), lambda i: (0, 0),
                                 pipeline_mode=pl.Buffered(1)),       # gamma
                    pl.BlockSpec((1, D), lambda i: (0, 0),
                                 pipeline_mode=pl.Buffered(1)),       # beta
                ],
                out_specs=pl.BlockSpec((tm_eff, D), lambda i: (i, 0)),
            ),
            compiler_params=pltpu.CompilerParams(
                dimension_semantics=("parallel",),
                vmem_limit_bytes=vmem_limit,
            ),
        )(x2, params["w1"], params["b1"], params["w2"], params["b2"],
          params["gamma"], params["beta"])
        return out2.reshape(B, S, D)

    # ---------------- H-tiled fallback: stream weights over hidden dim ------
    if hidden_tile is not None:
        th = hidden_tile
    else:
        th = H
        for cand in (2048, 1024, 512, 256, 128):
            if H % cand == 0:
                th = cand
                break
    if H % th != 0:
        th = H  # lane-axis blocks must tile H exactly

    def est_htiled(t):
        act = 4 * t * D * x_bytes
        weights = 4 * (D * th + th * D)           # bf16, double-buffered (k varies)
        acc = t * D * 4
        smalls = 4 * (2 * th + 3 * D)
        temps = 2 * t * th * 4 + 4 * t * D * 4
        return act + weights + acc + smalls + temps

    tm_eff = tm_req
    while tm_eff > 8 and est_htiled(tm_eff) > budget:
        tm_eff = max(8, _round_up(tm_eff // 2, 8))

    grid = (pl.cdiv(M, tm_eff), H // th)
    vmem_limit = int(min(budget, max(est_htiled(tm_eff) + 4 * _MIB, 32 * _MIB)))

    out2 = pl.pallas_call(
        _ffn_kernel_htiled,
        out_shape=jax.ShapeDtypeStruct((M, D), x.dtype),
        grid_spec=pltpu.PrefetchScalarGridSpec(
            num_scalar_prefetch=0,
            grid=grid,
            in_specs=[
                pl.BlockSpec((tm_eff, D), lambda i, k: (i, 0)),       # x rows
                pl.BlockSpec((D, th), lambda i, k: (0, k)),           # W1 tile
                pl.BlockSpec((1, th), lambda i, k: (0, k)),           # b1 tile
                pl.BlockSpec((th, D), lambda i, k: (k, 0)),           # W2 tile
                pl.BlockSpec((1, D), lambda i, k: (0, 0),
                             pipeline_mode=pl.Buffered(1)),           # b2
                pl.BlockSpec((1, D), lambda i, k: (0, 0),
                             pipeline_mode=pl.Buffered(1)),           # gamma
                pl.BlockSpec((1, D), lambda i, k: (0, 0),
                             pipeline_mode=pl.Buffered(1)),           # beta
            ],
            out_specs=pl.BlockSpec((tm_eff, D), lambda i, k: (i, 0)),
            scratch_shapes=[pltpu.VMEM((tm_eff, D), jnp.float32)],
        ),
        compiler_params=pltpu.CompilerParams(
            dimension_semantics=("parallel", "arbitrary"),
            vmem_limit_bytes=vmem_limit,
        ),
    )(x2, params["w1"], params["b1"], params["w2"], params["b2"],
      params["gamma"], params["beta"])
    return out2.reshape(B, S, D)


def _reference(x, w1, b1, w2, b2, gamma, beta):
    h = jnp.maximum(x @ w1 + b1, 0.0)
    out = h @ w2 + b2 + x
    mean = jnp.mean(out, axis=-1, keepdims=True)
    var = jnp.mean((out - mean) ** 2, axis=-1, keepdims=True)
    return (out - mean) / jnp.sqrt(var + _EPS) * gamma + beta


if __name__ == "__main__":
    # Small demo shapes consistent with the module: (batch, seq, dim_model), hidden.
    # NOTE: for v6e/v7x tuning use representative sizes (D>=512, H>=2048,
    # M in the thousands) -- this tiny problem exercises correctness only.
    B, S, D, H = 2, 8, 128, 256

    key = jax.random.PRNGKey(0)
    kx, k1, kb1, k2, kb2 = jax.random.split(key, 5)

    x = jax.random.normal(kx, (B, S, D), dtype=jnp.float32)

    lim1 = 1.0 / (D ** 0.5)
    lim2 = 1.0 / (H ** 0.5)
    w1 = jax.random.uniform(k1, (D, H), jnp.float32, -lim1, lim1)
    b1 = jax.random.uniform(kb1, (H,), jnp.float32, -lim1, lim1)
    w2 = jax.random.uniform(k2, (H, D), jnp.float32, -lim2, lim2)
    b2 = jax.random.uniform(kb2, (D,), jnp.float32, -lim2, lim2)
    gamma = jnp.ones((D,), jnp.float32)   # nn.LayerNorm default weight
    beta = jnp.zeros((D,), jnp.float32)   # nn.LayerNorm default bias

    params = prepare_ffn_params(w1, b1, w2, b2, gamma, beta)  # one-time casts
    ref = _reference(x, w1, b1, w2, b2, gamma, beta)

    # Fast path: weights fully VMEM-resident.
    out = jax.block_until_ready(position_wise_feed_forward(x, params))
    assert out.shape == (B, S, D)
    assert jnp.allclose(out, ref, atol=5e-2, rtol=5e-2), "resident-path mismatch"

    # H-tiled fallback path (forced at small shapes to validate the big-H route).
    out_h = jax.block_until_ready(
        position_wise_feed_forward(x, params, force_h_tiled=True, hidden_tile=128))
    assert jnp.allclose(out_h, ref, atol=5e-2, rtol=5e-2), "H-tiled-path mismatch"

    print("KERNEL_OK")
</pallas_src>

<mosaic_0001>
module attributes {stable_mosaic.version = 11 : i64} {
  func.func @_ffn_kernel_resident(%arg0: i32, %arg1: memref<16x128xf32, #tpu.memory_space<vmem>>, %arg2: memref<128x256xbf16, #tpu.memory_space<vmem>>, %arg3: memref<1x256xf32, #tpu.memory_space<vmem>>, %arg4: memref<256x128xbf16, #tpu.memory_space<vmem>>, %arg5: memref<1x128xf32, #tpu.memory_space<vmem>>, %arg6: memref<1x128xf32, #tpu.memory_space<vmem>>, %arg7: memref<1x128xf32, #tpu.memory_space<vmem>>, %arg8: memref<16x128xf32, #tpu.memory_space<vmem>>) attributes {dimension_semantics = [#tpu.dimension_semantics<parallel>], iteration_bounds = array<i64: 1>, scalar_prefetch = 0 : i64, scratch_operands = 0 : i64, tpu.core_type = #tpu.core_type<tc>, window_params = [{transform_indices = @transform_0, window_bounds = array<i64: 16, 128>}, {pipeline_mode = #tpu.pipeline_mode<synchronous>, transform_indices = @transform_1, window_bounds = array<i64: 128, 256>}, {pipeline_mode = #tpu.pipeline_mode<synchronous>, transform_indices = @transform_2, window_bounds = array<i64: 1, 256>}, {pipeline_mode = #tpu.pipeline_mode<synchronous>, transform_indices = @transform_3, window_bounds = array<i64: 256, 128>}, {pipeline_mode = #tpu.pipeline_mode<synchronous>, transform_indices = @transform_4, window_bounds = array<i64: 1, 128>}, {pipeline_mode = #tpu.pipeline_mode<synchronous>, transform_indices = @transform_5, window_bounds = array<i64: 1, 128>}, {pipeline_mode = #tpu.pipeline_mode<synchronous>, transform_indices = @transform_6, window_bounds = array<i64: 1, 128>}, {transform_indices = @transform_7, window_bounds = array<i64: 16, 128>}]} {
    %c0 = arith.constant 0 : index
    %c0_0 = arith.constant 0 : index
    %0 = vector.load %arg1[%c0, %c0_0] : memref<16x128xf32, #tpu.memory_space<vmem>>, vector<16x128xf32>
    %c0_1 = arith.constant 0 : index
    %c0_2 = arith.constant 0 : index
    %1 = vector.load %arg1[%c0_1, %c0_2] : memref<16x128xf32, #tpu.memory_space<vmem>>, vector<16x128xf32>
    %2 = arith.truncf %1 : vector<16x128xf32> to vector<16x128xbf16>
    %c0_3 = arith.constant 0 : index
    %c0_4 = arith.constant 0 : index
    %3 = vector.load %arg2[%c0_3, %c0_4] : memref<128x256xbf16, #tpu.memory_space<vmem>>, vector<128x256xbf16>
    %cst = arith.constant dense<0.000000e+00> : vector<16x256xf32>
    %4 = tpu.matmul %2, %3, %cst {dimension_numbers = #tpu.dot_dimension_numbers<[1], [0], [0], [1], [0, 0, 1, 1], [], []>} : vector<16x128xbf16>, vector<128x256xbf16>, vector<16x256xf32> -> vector<16x256xf32>
    %c0_5 = arith.constant 0 : index
    %c0_6 = arith.constant 0 : index
    %5 = vector.load %arg3[%c0_5, %c0_6] : memref<1x256xf32, #tpu.memory_space<vmem>>, vector<1x256xf32>
    %6 = vector.broadcast %5 : vector<1x256xf32> to vector<16x256xf32>
    %7 = arith.addf %4, %6 : vector<16x256xf32>
    %cst_7 = arith.constant 0.000000e+00 : f32
    %8 = vector.broadcast %cst_7 : f32 to vector<16x256xf32>
    %9 = arith.maximumf %7, %8 : vector<16x256xf32>
    %10 = arith.truncf %9 : vector<16x256xf32> to vector<16x256xbf16>
    %c0_8 = arith.constant 0 : index
    %c0_9 = arith.constant 0 : index
    %11 = vector.load %arg4[%c0_8, %c0_9] : memref<256x128xbf16, #tpu.memory_space<vmem>>, vector<256x128xbf16>
    %cst_10 = arith.constant dense<0.000000e+00> : vector<16x128xf32>
    %12 = tpu.matmul %10, %11, %cst_10 {dimension_numbers = #tpu.dot_dimension_numbers<[1], [0], [0], [1], [0, 0, 1, 1], [], []>} : vector<16x256xbf16>, vector<256x128xbf16>, vector<16x128xf32> -> vector<16x128xf32>
    %c0_11 = arith.constant 0 : index
    %c0_12 = arith.constant 0 : index
    %13 = vector.load %arg5[%c0_11, %c0_12] : memref<1x128xf32, #tpu.memory_space<vmem>>, vector<1x128xf32>
    %14 = vector.broadcast %13 : vector<1x128xf32> to vector<16x128xf32>
    %15 = arith.addf %12, %14 : vector<16x128xf32>
    %16 = arith.addf %15, %0 : vector<16x128xf32>
    %cst_13 = arith.constant dense<0.000000e+00> : vector<16xf32>
    %17 = vector.multi_reduction <add>, %16, %cst_13 [1] : vector<16x128xf32> to vector<16xf32>
    %18 = vector.shape_cast %17 : vector<16xf32> to vector<16x1xf32>
    %cst_14 = arith.constant 1.280000e+02 : f32
    %19 = vector.broadcast %cst_14 : f32 to vector<16x1xf32>
    %20 = arith.divf %18, %19 : vector<16x1xf32>
    %21 = vector.broadcast %20 : vector<16x1xf32> to vector<16x128xf32>
    %22 = arith.subf %16, %21 : vector<16x128xf32>
    %23 = arith.mulf %22, %22 : vector<16x128xf32>
    %cst_15 = arith.constant dense<0.000000e+00> : vector<16xf32>
    %24 = vector.multi_reduction <add>, %23, %cst_15 [1] : vector<16x128xf32> to vector<16xf32>
    %25 = vector.shape_cast %24 : vector<16xf32> to vector<16x1xf32>
    %cst_16 = arith.constant 1.280000e+02 : f32
    %26 = vector.broadcast %cst_16 : f32 to vector<16x1xf32>
    %27 = arith.divf %25, %26 : vector<16x1xf32>
    %cst_17 = arith.constant 9.99999974E-6 : f32
    %28 = vector.broadcast %cst_17 : f32 to vector<16x1xf32>
    %29 = arith.addf %27, %28 : vector<16x1xf32>
    %30 = math.rsqrt %29 : vector<16x1xf32>
    %31 = vector.broadcast %30 : vector<16x1xf32> to vector<16x128xf32>
    %32 = arith.mulf %22, %31 : vector<16x128xf32>
    %c0_18 = arith.constant 0 : index
    %c0_19 = arith.constant 0 : index
    %33 = vector.load %arg6[%c0_18, %c0_19] : memref<1x128xf32, #tpu.memory_space<vmem>>, vector<1x128xf32>
    %34 = vector.broadcast %33 : vector<1x128xf32> to vector<16x128xf32>
    %35 = arith.mulf %32, %34 : vector<16x128xf32>
    %c0_20 = arith.constant 0 : index
    %c0_21 = arith.constant 0 : index
    %36 = vector.load %arg7[%c0_20, %c0_21] : memref<1x128xf32, #tpu.memory_space<vmem>>, vector<1x128xf32>
    %37 = vector.broadcast %36 : vector<1x128xf32> to vector<16x128xf32>
    %38 = arith.addf %35, %37 : vector<16x128xf32>
    %c0_22 = arith.constant 0 : index
    %c0_23 = arith.constant 0 : index
    %39 = vector.load %arg8[%c0_22, %c0_23] : memref<16x128xf32, #tpu.memory_space<vmem>>, vector<16x128xf32>
    tpu.vector_store %arg8[%c0_22, %c0_23], %38 {strides = array<i32>} : memref<16x128xf32, #tpu.memory_space<vmem>>, vector<16x128xf32>,
    return
  }
  func.func @transform_0(%arg0: i32) -> (i32, i32) {
    %c0_i32 = arith.constant 0 : i32
    %c0_i32_0 = arith.constant 0 : i32
    return %arg0, %c0_i32 : i32, i32
  }
  func.func @transform_1(%arg0: i32) -> (i32, i32) {
    %c0_i32 = arith.constant 0 : i32
    %c0_i32_0 = arith.constant 0 : i32
    %c0_i32_1 = arith.constant 0 : i32
    return %c0_i32, %c0_i32_0 : i32, i32
  }
  func.func @transform_2(%arg0: i32) -> (i32, i32) {
    %c0_i32 = arith.constant 0 : i32
    %c0_i32_0 = arith.constant 0 : i32
    %c0_i32_1 = arith.constant 0 : i32
    return %c0_i32, %c0_i32_0 : i32, i32
  }
  func.func @transform_3(%arg0: i32) -> (i32, i32) {
    %c0_i32 = arith.constant 0 : i32
    %c0_i32_0 = arith.constant 0 : i32
    %c0_i32_1 = arith.constant 0 : i32
    return %c0_i32, %c0_i32_0 : i32, i32
  }
  func.func @transform_4(%arg0: i32) -> (i32, i32) {
    %c0_i32 = arith.constant 0 : i32
    %c0_i32_0 = arith.constant 0 : i32
    %c0_i32_1 = arith.constant 0 : i32
    return %c0_i32, %c0_i32_0 : i32, i32
  }
  func.func @transform_5(%arg0: i32) -> (i32, i32) {
    %c0_i32 = arith.constant 0 : i32
    %c0_i32_0 = arith.constant 0 : i32
    %c0_i32_1 = arith.constant 0 : i32
    return %c0_i32, %c0_i32_0 : i32, i32
  }
  func.func @transform_6(%arg0: i32) -> (i32, i32) {
    %c0_i32 = arith.constant 0 : i32
    %c0_i32_0 = arith.constant 0 : i32
    %c0_i32_1 = arith.constant 0 : i32
    return %c0_i32, %c0_i32_0 : i32, i32
  }
  func.func @transform_7(%arg0: i32) -> (i32, i32) {
    %c0_i32 = arith.constant 0 : i32
    %c0_i32_0 = arith.constant 0 : i32
    return %arg0, %c0_i32 : i32, i32
  }
}

</mosaic_0001>

<bundles_post_ra>
// kernel: tpu_custom_call.1
= control target key start
LH: loop header
LB: loop body
LE: loop exit
PB: predicated region body
PF: predicated region fallthrough
CT: control target
= control target key end

     0   :  { %12 = vsyncpa [#allocation3], 0  ;;  %s746_s0 = inlined_call_operand.hbm [shape: f32[16,128], index: 0, kind: input, shape index: {}]   ;;  %s747_s1 = inlined_call_operand.hbm [shape: bf16[128,256], index: 1, kind: input, shape index: {}]   ;;  %s748_s2 = inlined_call_operand.vmem [shape: f32[1,256], index: 2, kind: input, shape index: {}]   ;;  %s749_s3 = inlined_call_operand.hbm [shape: bf16[256,128], index: 3, kind: input, shape index: {}]   ;;  %s750_s4 = inlined_call_operand.vmem [shape: f32[1,128], index: 4, kind: input, shape index: {}]   ;;  %s751_s5 = inlined_call_operand.vmem [shape: f32[1,128], index: 5, kind: input, shape index: {}]   ;;  %s752_s6 = inlined_call_operand.vmem [shape: f32[1,128], index: 6, kind: input, shape index: {}]   ;;  %s753_s7 = inlined_call_operand.hbm [shape: f32[16,128], index: 7, kind: output, shape index: {}]  }
   0x1   :  { %13 = vsyncpa [#allocation6], 0 }
   0x2   :  { %14 = vsyncpa [#allocation4], 0  ;;  %s664_s24 = smov [#allocation5]   ;;  %s665_s26 = smov [#allocation2]  }
   0x3   :  { %s32_s25 = sshll.u32 %s664_s24, 4  ;;  %s20_s27 = sshll.u32 %s665_s26, 4  ;;  %s33_s25 = int_to_ptr.vmem [resolvable:$true] %s32_s25  ;;  %s21_s27 = int_to_ptr.vmem [resolvable:$true] %s20_s27 }
   0x4   :  { %s586_s28 = scalar_lea.vmem %s33_s25, 2048  ;;  %p591_p1 = scmp.lt.s32.totalorder %s33_s25, %s33_s25 }
   0x5   :  { %p587_p0 = scmp.ne.s32.totalorder %s33_s25, %s586_s28  ;;  %p592_p2 = scmp.lt.s32.totalorder %s586_s28, %s586_s28 }
   0x7   :  { %p593_p3 = por %p592_p2, %p591_p1 }
   0x9   :  { %p594_p4 = pnand %p593_p3, %p587_p0 }
   0xb   :  { %597 = shalt.err (!%p594_p4)
}
   0xc   :  { %s666_s29 = smov 128   ;;  %s667_s30 = smov 8  }
   0xd   :  { %38 = dma.hbm_to_vmem [thread:$0]  %s747_s1, 2048, %s33_s25, [#allocation6], %s666_s29, %s666_s29, %s667_s30  }
   0xe   :  { %s606_s10 = scalar_lea.vmem %s21_s27, 256  ;;  %p611_p6 = scmp.lt.s32.totalorder %s21_s27, %s21_s27 }
   0xf   :  { %p607_p5 = scmp.ne.s32.totalorder %s21_s27, %s606_s10  ;;  %p612_p7 = scmp.lt.s32.totalorder %s606_s10, %s606_s10 }
  0x11   :  { %p613_p8 = por %p612_p7, %p611_p6 }
  0x13   :  { %p614_p9 = pnand %p613_p8, %p607_p5 }
  0x15   :  { %617 = shalt.err (!%p614_p9)
}
  0x16   :  { %26 = dma.hbm_to_vmem [thread:$0]  %s746_s0, 256, %s21_s27, [#allocation3], %s666_s29, %s666_s29, %s667_s30  }
  0x17   :  { %s668_s13 = smov [#allocation7]  }
  0x18   :  { %s46_s14 = sshll.u32 %s668_s13, 4  ;;  %s47_s14 = int_to_ptr.vmem [resolvable:$true] %s46_s14 }
  0x19   :  { %s626_s15 = scalar_lea.vmem %s47_s14, 2048  ;;  %p631_p11 = scmp.lt.s32.totalorder %s47_s14, %s47_s14 }
  0x1a   :  { %p627_p10 = scmp.ne.s32.totalorder %s47_s14, %s626_s15  ;;  %p632_p12 = scmp.lt.s32.totalorder %s626_s15, %s626_s15 }
  0x1c   :  { %p633_p13 = por %p632_p12, %p631_p11 }
  0x1e   :  { %p634_p0 = pnand %p633_p13, %p627_p10 }
  0x20   :  { %637 = shalt.err (!%p634_p0)
}
  0x21   :  { %s669_s1 = smov 64   ;;  %s670_s16 = smov 4  }
  0x22   :  { %52 = dma.hbm_to_vmem [thread:$0]  %s749_s3, 2048, %s47_s14, [#allocation6], %s669_s1, %s669_s1, %s670_s16  }
  0x23   :  { %658 = dma.done.wait [#allocation3], 256  }
  0x24   :  { %659 = vsyncadd [#allocation3], 4294967040 }
  0x25   :  { %660 = dma.done.wait [#allocation6], 4096  }
  0x26   :  { %661 = vsyncadd [#allocation6], 4294963200  ;;  %v671_v0 = vmov 0   ;;  %v534_v1 = vld [vmem:[#allocation5 + $0x74] ss:$8 sps:$4 sm:$0xff]   ;;  %v562_v16 = vld [vmem:[#allocation7 + $0x68] sm:$0xff]   ;;  %v90_v36 = vlaneseq }
  0x27   :  { %212 = vmatprep.mubr.bf16.mxu0 %v671_v0  ;;  %v536_v2 = vld [vmem:[#allocation5 + $0x70] ss:$8 sps:$4 sm:$0xff]   ;;  %180 = vmatprep.subr.bf16.mxu0 %v534_v1  ;;  %v537_v3 = vld [vmem:[#allocation5 + $0x64] ss:$8 sps:$4 sm:$0xff]   ;;  %v539_v4 = vld [vmem:[#allocation5 + $0x60] ss:$8 sps:$4 sm:$0xff]  }
  0x28   :  { %181 = vmatpush1.bf16.msra.mxu0 %v536_v2  ;;  %v540_v5 = vld [vmem:[#allocation5 + $0x54] ss:$8 sps:$4 sm:$0xff]   ;;  %v542_v6 = vld [vmem:[#allocation5 + $0x50] ss:$8 sps:$4 sm:$0xff]   ;;  %v543_v7 = vld [vmem:[#allocation5 + $0x44] ss:$8 sps:$4 sm:$0xff]  }
  0x29   :  { %182 = vmatprep.subr.bf16.mxu0 %v537_v3  ;;  %v545_v8 = vld [vmem:[#allocation5 + $0x40] ss:$8 sps:$4 sm:$0xff]   ;;  %v546_v9 = vld [vmem:[#allocation5 + $0x34] ss:$8 sps:$4 sm:$0xff]   ;;  %v548_v11 = vld [vmem:[#allocation5 + $0x30] ss:$8 sps:$4 sm:$0xff]  }
  0x2a   :  { %v558_v10 = vld [vmem:[#allocation7 + $0x78] sm:$0xff]   ;;  %v549_v13 = vld [vmem:[#allocation5 + $0x24] ss:$8 sps:$4 sm:$0xff]   ;;  %v560_v14 = vld [vmem:[#allocation7 + $0x70] sm:$0xff]   ;;  %v91_v37 = vshrl.u32 %v90_v36, 7  ;;  %s672_s23 = smov [#allocation8]  }
  0x2b   :  { %v559_v12 = vld [vmem:[#allocation7 + $0x38] sm:$0xff]   ;;  %503 = vmatprep.subr.bf16.mxu1 %v558_v10  ;;  %v561_v15 = vld [vmem:[#allocation7 + $0x30] sm:$0xff]   ;;  %v551_v17 = vld [vmem:[#allocation5 + $0x20] ss:$8 sps:$4 sm:$0xff]   ;;  %s455_s24 = sshll.u32 %s672_s23, 4  ;;  %s456_s24 = int_to_ptr.vmem [resolvable:$true] %s455_s24 }
  0x2c   :  { %183 = vmatpush1.bf16.msra.mxu0 %v539_v4  ;;  %504 = vmatpush3.bf16.msra.mxu1 %v559_v12  ;;  %v552_v18 = vld [vmem:[#allocation5 + $0x14] ss:$8 sps:$4 sm:$0xff]   ;;  %v563_v19 = vld [vmem:[#allocation7 + $0x28] sm:$0xff]   ;;  %v564_v20 = vld [vmem:[#allocation7 + $0x60] sm:$0xff]   ;;  %v96_v38 = vsub.s32 1, %v91_v37  ;;  %v92_v39 = vsub.s32 0, %v91_v37  ;;  %p643_p2 = scmp.lt.s32.totalorder %s456_s24, %s456_s24 }
  0x2d   :  { %184 = vmatprep.subr.bf16.mxu0 %v540_v5  ;;  %505 = vmatprep.subr.bf16.mxu1 %v560_v14  ;;  %v554_v21 = vld [vmem:[#allocation5 + $0x10] ss:$8 sps:$4 sm:$0xff]   ;;  %v565_v22 = vld [vmem:[#allocation7 + $0x20] sm:$0xff]   ;;  %v570_v32 = vld [vmem:[#allocation7 + $0x48] sm:$0xff]   ;;  %s638_s25 = scalar_lea.vmem %s456_s24, 256 }
  0x2e   :  { %v555_v23 = vld [vmem:[#allocation5 + $0x4] ss:$8 sps:$4 sm:$0xff]   ;;  %v566_v24 = vld [vmem:[#allocation7 + $0x58] sm:$0xff]   ;;  %v557_v25 = vld [vmem:[#allocation5] ss:$8 sps:$4 sm:$0xff]   ;;  %p639_p1 = scmp.ne.s32.totalorder %s456_s24, %s638_s25  ;;  %p644_p3 = scmp.lt.s32.totalorder %s638_s25, %s638_s25 }
  0x2f   :  { %v69_v26 = vld [vmem:[#allocation2] sm:$0xff]  ;;  %v70_v27 = vld [vmem:[#allocation2 + $0x8] sm:$0xff]  ;;  %v571_v33 = vld [vmem:[#allocation7 + $0x8] sm:$0xff]  }
  0x30   :  { %185 = vmatpush1.bf16.msra.mxu0 %v542_v6  ;;  %506 = vmatpush3.bf16.msra.mxu1 %v561_v15  ;;  %v567_v28 = vld [vmem:[#allocation7 + $0x18] sm:$0xff]   ;;  %v71_v29 = vpack.c.bf16 %v70_v27, %v69_v26  ;;  %v568_v30 = vld [vmem:[#allocation7 + $0x50] sm:$0xff]   ;;  %v572_v34 = vld [vmem:[#allocation7 + $0x40] sm:$0xff]   ;;  %p645_p4 = por %p644_p3, %p643_p2 }
  0x31   :  { %186 = vmatprep.subr.bf16.mxu0 %v543_v7  ;;  %507 = vmatprep.subr.bf16.mxu1 %v562_v16  ;;  %v569_v31 = vld [vmem:[#allocation7 + $0x10] sm:$0xff]   ;;  %v573_v35 = vld [vmem:[#allocation7] sm:$0xff]  }
  0x32   :  { %v88_v40 = vld [vmem:[%s748_s2] sm:$0x3]  ;;  %p646_p5 = pnand %p645_p4, %p639_p1 }
  0x33   :  { %v97_v42 = vrot.slane %v88_v40, %v96_v38  ;;  %v93_v43 = vrot.slane %v88_v40, %v92_v39  ;;  %v484_v58 = vld [vmem:[%s750_s4] ss:$0 sm:$0xff] }
  0x34   :  { %187 = vmatpush1.bf16.msra.mxu0 %v545_v8  ;;  %508 = vmatpush3.bf16.msra.mxu1 %v563_v19  ;;  %v501_v19 = vld [vmem:[%s751_s5] ss:$0 sm:$0xff] }
  0x35   :  { %188 = vmatprep.subr.bf16.mxu0 %v546_v9  ;;  %509 = vmatprep.subr.bf16.mxu1 %v564_v20 }
  0x38   :  { %189 = vmatpush1.bf16.msra.mxu0 %v548_v11  ;;  %510 = vmatpush3.bf16.msra.mxu1 %v565_v22 }
  0x39   :  { %190 = vmatprep.subr.bf16.mxu0 %v549_v13  ;;  %511 = vmatprep.subr.bf16.mxu1 %v566_v24 }
  0x3c   :  { %191 = vmatpush1.bf16.msra.mxu0 %v551_v17  ;;  %512 = vmatpush3.bf16.msra.mxu1 %v567_v28 }
  0x3d   :  { %192 = vmatprep.subr.bf16.mxu0 %v552_v18  ;;  %513 = vmatprep.subr.bf16.mxu1 %v568_v30 }
  0x40   :  { %193 = vmatpush1.bf16.msra.mxu0 %v554_v21  ;;  %514 = vmatpush3.bf16.msra.mxu1 %v569_v31  ;;  %v502_v21 = vld [vmem:[%s752_s6] ss:$0 sm:$0xff] }
  0x41   :  { %194 = vmatprep.subr.bf16.mxu0 %v555_v23  ;;  %515 = vmatprep.subr.bf16.mxu1 %v570_v32 }
  0x44   :  { %195 = vmatpush1.bf16.msra.mxu0 %v557_v25  ;;  %516 = vmatpush3.bf16.msra.mxu1 %v571_v33 }
  0x45   :  { %517 = vmatprep.subr.bf16.mxu1 %v572_v34 }
  0x47   :  { %213 = vmatmul.mubr.bf16.vlgmr.msra.gmra.mxu0 %v71_v29 }
  0x48   :  { %518 = vmatpush3.bf16.msra.mxu1 %v573_v35 }
 0x107   :  { %v214_v41 = vpop.f32.mrf.mxu0 }
 0x108   :  { %v215_v48 = vadd.f32 %v214_v41, %v93_v43 }
 0x109   :  { %v216_v44 = vpop.f32.mrf.mxu0 }
 0x10a   :  { %v217_v46 = vadd.f32 %v216_v44, %v97_v42  ;;  %v223_v54 = vmax.f32 %v215_v48, 0.0 }
 0x10b   :  { %v218_v45 = vpop.f32.mrf.mxu0 }
 0x10c   :  { %v219_v47 = vadd.f32 %v218_v45, %v93_v43  ;;  %v224_v52 = vmax.f32 %v217_v46, 0.0 }
 0x10d   :  { %v220_v49 = vpop.f32.mrf.mxu0 }
 0x10e   :  { %v221_v50 = vadd.f32 %v220_v49, %v97_v42  ;;  %v225_v51 = vmax.f32 %v219_v47, 0.0 }
 0x110   :  { %v226_v53 = vmax.f32 %v221_v50, 0.0  ;;  %v227_v56 = vpack.c.bf16 %v225_v51, %v223_v54 }
 0x112   :  { %v228_v55 = vpack.c.bf16 %v226_v53, %v224_v52 }
 0x114   :  { %396 = vmatprep.mubr.bf16.mxu1 %v228_v55 }
 0x115   :  { %397 = vmatmul.mubr.bf16.vlgmr.msra.gmra.mxu1 %v227_v56 }
 0x1d5   :  { %v519_v57 = vpop.f32.mrf.mxu1 }
 0x1d7   :  { %v520_v59 = vpop.f32.mrf.mxu1 }
 0x1d8   :  { %v521_v60 = vadd.f32 %v520_v59, %v519_v57 }
 0x1d9   :  { %v522_v61 = vpop.f32.mrf.mxu1 }
 0x1da   :  { %v399_v62 = vadd.f32 %v521_v60, %v484_v58 }
 0x1db   :  { %v523_v63 = vpop.f32.mrf.mxu1 }
 0x1dc   :  { %v524_v0 = vadd.f32 %v523_v63, %v522_v61  ;;  %v405_v1 = vadd.f32 %v399_v62, %v69_v26 }
 0x1de   :  { %v402_v2 = vadd.f32 %v524_v0, %v484_v58  ;;  %407 = vadd.xlane.f32.xlu0 %v405_v1 }
 0x1e0   :  { %v406_v3 = vadd.f32 %v402_v2, %v70_v27 }
 0x1e2   :  { %409 = vadd.xlane.f32.xlu0 %v406_v3 }
 0x267   :  { %v408_v4 = vpop.xlane.xlu0 %407 }
 0x268   :  { %v412_v5 = vmul.f32 0.0078125, %v408_v4 }
 0x26a   :  { %v414_v6 = vsub.f32 %v405_v1, %v412_v5 }
 0x26b   :  { %v410_v7 = vpop.xlane.xlu0 %409 }
 0x26c   :  { %v413_v8 = vmul.f32 0.0078125, %v410_v7  ;;  %v416_v9 = vmul.f32 %v414_v6, %v414_v6 }
 0x26e   :  { %v415_v10 = vsub.f32 %v406_v3, %v413_v8  ;;  %418 = vadd.xlane.f32.xlu1 %v416_v9 }
 0x270   :  { %v417_v11 = vmul.f32 %v415_v10, %v415_v10 }
 0x272   :  { %420 = vadd.xlane.f32.xlu1 %v417_v11 }
 0x2f7   :  { %v419_v12 = vpop.xlane.xlu1 %418 }
 0x2f8   :  { %v422_v13 = vmul.f32 0.0078125, %v419_v12 }
 0x2fa   :  { %v424_v14 = vadd.f32 1e-05, %v422_v13 }
 0x2fb   :  { %v421_v15 = vpop.xlane.xlu1 %420 }
 0x2fc   :  { %574 = vrsqrt.f32 %v424_v14  ;;  %v423_v16 = vmul.f32 0.0078125, %v421_v15 }
 0x2fe   :  { %v425_v17 = vadd.f32 1e-05, %v423_v16 }
 0x300   :  { %576 = vrsqrt.f32 %v425_v17 }
 0x309   :  { %v575_v18 = vpop.eup %574 }
 0x30a   :  { %v428_v20 = vmul.f32 %v575_v18, %v414_v6 }
 0x30c   :  { %v437_v22 = vmul.f32 %v501_v19, %v428_v20 }
 0x30d   :  { %v577_v23 = vpop.eup %576 }
 0x30e   :  { %v429_v24 = vmul.f32 %v577_v23, %v415_v10  ;;  %v446_v25 = vadd.f32 %v502_v21, %v437_v22 }
 0x310   :  { %v438_v26 = vmul.f32 %v501_v19, %v429_v24  ;;  %448 = vst [vmem:[#allocation8] sm:$0xff] %v446_v25 }
 0x312   :  { %v447_v27 = vadd.f32 %v502_v21, %v438_v26 }
 0x314   :  { %449 = vst [vmem:[#allocation8 + $0x8] sm:$0xff] %v447_v27 }
 0x315   :  { %649 = shalt.err (!%p646_p5)
}
 0x316   :  { %461 = dma.vmem_to_hbm [thread:$0]  %s456_s24, 256, %s753_s7, [#allocation4], %s666_s29, %s666_s29, %s667_s30  }
 0x317   :  { %662 = dma.done.wait [#allocation4], 256  }
 0x318   :  { %663 = vsyncadd [#allocation4], 4294967040 }
 0x319   :  { %465 = vsyncpa [#allocation3], 1 }
 0x31a   :  { %466 = vsyncpa [#allocation6], 1 }
 0x31b   :  { %467 = vsyncpa [#allocation4], 1 }

</bundles_post_ra>
